<compile_context>
chip_gen: v7x
topology: tpu7x:2x2x1
jax: 0.10.0
libtpu: 0.0.40
codegen_flags: <defaults>
</compile_context>

<pallas_src>
import jax
import jax.numpy as jnp
from jax.experimental import pallas as pl
from jax.experimental.pallas import tpu as pltpu


def _cdiv(a, b):
    return -(-a // b)


def _vmem_capacity_bytes() -> int:
    try:
        return int(pltpu.get_tpu_info().vmem_capacity_bytes)
    except Exception:
        return 64 * 1024 * 1024  # conservative default: v7x per-TensorCore VMEM


def _copy_kernel(x_ref, o_ref):
    # Strided-read path: the input BlockSpec already selected only the lanes we
    # keep (row t*factor of the original layout), so the body is a pure copy.
    o_ref[...] = x_ref[...]


def _make_lane_select_kernel(d):
    # Contiguous-read path: the block holds the whole factor-group per output
    # row (factor*D lanes); keep the first D lanes, drop the rest in vregs.
    def kernel(x_ref, o_ref):
        o_ref[...] = x_ref[...][:, :, :d]
    return kernel


def downsampling(x: jax.Array, factor: int, *, tile_rows_out=None) -> jax.Array:
    """Pallas TPU implementation of `inputs[:, ::factor, :]` for a (B, T, D) array."""
    assert factor >= 1
    if factor == 1:
        return x  # step-1 slice is the identity; never pay an HBM round trip
    B, T, D = x.shape
    T_out = _cdiv(T, factor)  # matches Python/PyTorch slicing semantics

    itemsize = jnp.dtype(x.dtype).itemsize
    sublane = max(8, 32 // itemsize)  # 8 (f32) / 16 (bf16) / 32 (int8)

    # Ragged T: pad by < factor rows so the free regrouping reshape is legal.
    # Pad rows are never selected, so they never reach the output.
    # TODO(synk): a strided-source HBM DMA path would avoid this extra copy.
    if T_out * factor != T:
        x = jnp.pad(x, ((0, 0), (0, T_out * factor - T), (0, 0)))

    # Free (bitcast) row-major regroup: (B, T_out*factor, D) -> (B, T_out, factor*D).
    xr = jnp.reshape(x, (B, T_out, factor * D))

    # DMA-descriptor vs. bandwidth cutoff (perf review): the strided read emits
    # one descriptor per D*itemsize-byte row, so for short rows at small factor
    # reading the whole group contiguously is faster despite factor x bytes.
    row_bytes = D * itemsize
    strided_legal = (D % 128) == 0  # narrow lane-block must be a multiple of 128 lanes
    use_strided = strided_legal and (row_bytes >= 2048 or (factor >= 4 and row_bytes >= 512))

    vmem_cap = _vmem_capacity_bytes()
    vmem_limit = (min(vmem_cap, 128 * 1024 * 1024) * 7) // 8
    target_block_bytes = vmem_cap // 8  # single-buffered input block budget

    in_row_bytes = row_bytes if use_strided else factor * row_bytes
    tile_to = max(1, target_block_bytes // in_row_bytes)
    if tile_rows_out is not None:  # test / tuning override
        tile_to = int(tile_rows_out)
    if tile_to >= T_out:
        tile_to = T_out  # single block equal to the full dim: always legal
    else:
        tile_to = max(sublane, (tile_to // sublane) * sublane)
        tile_to = min(tile_to, T_out)

    n_t = _cdiv(T_out, tile_to)  # partial last block is masked by Pallas

    if use_strided:
        kernel = _copy_kernel
        in_spec = pl.BlockSpec((1, tile_to, D), lambda t, b: (b, t, 0))
    else:
        kernel = _make_lane_select_kernel(D)
        in_spec = pl.BlockSpec((1, tile_to, factor * D), lambda t, b: (b, t, 0))

    out = pl.pallas_call(
        kernel,
        out_shape=jax.ShapeDtypeStruct((B, T_out, D), x.dtype),  # exact shape, no pad/strip
        grid=(n_t, B),  # time tiles first so small-B still splits across both cores
        in_specs=[in_spec],
        out_specs=pl.BlockSpec((1, tile_to, D), lambda t, b: (b, t, 0)),
        compiler_params=pltpu.CompilerParams(
            dimension_semantics=("parallel", "parallel"),
            vmem_limit_bytes=vmem_limit,
        ),
    )(xr)
    return out


if __name__ == "__main__":
    key = jax.random.PRNGKey(0)

    # (B, T, D, factor, dtype, tile_rows_out override)
    cases = [
        (2, 16, 32, 2, jnp.float32, None),   # contiguous path, small D, single tile
        (2, 30, 512, 3, jnp.float32, 8),     # strided-read path, ragged T_out=10 over 8-row tiles
        (2, 26, 32, 3, jnp.float32, None),   # ragged T (input pad) + contiguous path
        (2, 64, 128, 4, jnp.float32, 8),     # strided path via factor>=4 cutoff, multi-tile
        (2, 32, 64, 2, jnp.bfloat16, None),  # sub-32-bit dtype through contiguous path
    ]

    for idx, (B, T, D, factor, dtype, tile) in enumerate(cases):
        key, sub = jax.random.split(key)
        x = jax.random.normal(sub, (B, T, D), dtype=jnp.float32).astype(dtype)

        out = jax.block_until_ready(downsampling(x, factor, tile_rows_out=tile))

        ref = x[:, ::factor, :]  # reference = PyTorch slicing semantics
        assert out.shape == ref.shape, (idx, out.shape, ref.shape)
        assert jnp.array_equal(out, ref), f"Pallas downsampling mismatch (case {idx})"

    print("KERNEL_OK")
</pallas_src>

<mosaic_0001>
module attributes {stable_mosaic.version = 11 : i64} {
  func.func @kernel(%arg0: i32, %arg1: i32, %arg2: memref<1x8x64xf32, #tpu.memory_space<vmem>>, %arg3: memref<1x8x32xf32, #tpu.memory_space<vmem>>) attributes {dimension_semantics = [#tpu.dimension_semantics<parallel>, #tpu.dimension_semantics<parallel>], iteration_bounds = array<i64: 1, 2>, scalar_prefetch = 0 : i64, scratch_operands = 0 : i64, tpu.core_type = #tpu.core_type<tc>, window_params = [{transform_indices = @transform_0, window_bounds = array<i64: 1, 8, 64>}, {transform_indices = @transform_1, window_bounds = array<i64: 1, 8, 32>}]} {
    %c0 = arith.constant 0 : index
    %c0_0 = arith.constant 0 : index
    %c0_1 = arith.constant 0 : index
    %0 = vector.load %arg2[%c0, %c0_0, %c0_1] : memref<1x8x64xf32, #tpu.memory_space<vmem>>, vector<1x8x64xf32>
    %1 = vector.extract_strided_slice %0 {offsets = [0, 0, 0], sizes = [1, 8, 32], strides = [1, 1, 1]} : vector<1x8x64xf32> to vector<1x8x32xf32>
    %c0_2 = arith.constant 0 : index
    %c0_3 = arith.constant 0 : index
    %c0_4 = arith.constant 0 : index
    %2 = vector.load %arg3[%c0_2, %c0_3, %c0_4] : memref<1x8x32xf32, #tpu.memory_space<vmem>>, vector<1x8x32xf32>
    tpu.vector_store %arg3[%c0_2, %c0_3, %c0_4], %1 {strides = array<i32>} : memref<1x8x32xf32, #tpu.memory_space<vmem>>, vector<1x8x32xf32>,
    return
  }
  func.func @transform_0(%arg0: i32, %arg1: i32) -> (i32, i32, i32) {
    %c0_i32 = arith.constant 0 : i32
    %c0_i32_0 = arith.constant 0 : i32
    return %arg1, %arg0, %c0_i32 : i32, i32, i32
  }
  func.func @transform_1(%arg0: i32, %arg1: i32) -> (i32, i32, i32) {
    %c0_i32 = arith.constant 0 : i32
    %c0_i32_0 = arith.constant 0 : i32
    return %arg1, %arg0, %c0_i32 : i32, i32, i32
  }
}

</mosaic_0001>

<bundles_post_ra>
// kernel: tpu_custom_call.1
= control target key start
LH: loop header
LB: loop body
LE: loop exit
PB: predicated region body
PF: predicated region fallthrough
CT: control target
= control target key end

     0   :  { %6 = vsyncpa [#allocation3], 0  ;;  %s620_s0 = inlined_call_operand.hbm [shape: f32[2,8,64], index: 0, kind: input, shape index: {}]   ;;  %s621_s1 = inlined_call_operand.hbm [shape: f32[2,8,32], index: 1, kind: output, shape index: {}]  }
   0x1   :  { %8 = vsyncpa [#allocation3 + $0x1], 0 }
   0x2   :  { %9 = vsyncpa [#allocation4], 0 }
   0x3   :  { %11 = vsyncpa [#allocation4 + $0x1], 0  ;;  %s448_s6 = smov 0   ;;  %s450_s7 = smov 0  }
   0x4   :  { %s452_s8 = smov 0   ;;  %s454_s9 = smov 0  }
   0x5   :  { %s456_s10 = smov 0   ;;  %s458_s11 = smov 0  }
   0x6 LB: > { %s247_s12 = sadd.s32 4294967295, %s434_s11   ;;  %s248_s13 = sadd.s32 4294967294, %s434_s11   ;;  %s434_s11 = sphi %s458_s11, %s17_s11   ;;  %s430_s10 = sphi %s456_s10, %s637_s10   ;;  %s426_s9 = sphi %s454_s9, %s636_s9   ;;  %s422_s8 = sphi %s452_s8, %s635_s8   ;;  %s418_s7 = sphi %s450_s7, %s634_s7   ;;  %s414_s6 = sphi %s448_s6, %s633_s6  }
   0x7   : > { %s26_s14 = sadd.s32 1, %s430_s10  ;;  %s38_s15 = sadd.s32 1, %s422_s8 }
   0x8   : > { %p27_p0 = scmp.ge.s32.totalorder %s26_s14, 2  ;;  %p45_p1 = scmp.ne.s32.totalorder %s422_s8, %s418_s7 }
   0x9   : > { %p46_p2 = scmp.eq.s32.totalorder %s434_s11, 0  ;;  %p51_p3 = scmp.ne.s32.totalorder %s418_s7, %s414_s6 }
   0xa   : > { %s639_s14 = smov (%p27_p0, %s26_s14), 0  ;;  %p52_p5 = scmp.eq.s32.totalorder %s247_s12, 0 }
   0xb   : > { %p489_p4 = por %p46_p2, %p45_p1  ;;  %s33_s17 = ssub.s32 %s430_s10, %s639_s14 }
   0xc   : > { %p77_p6 = scmp.eq.s32.totalorder %s247_s12, 1  ;;  %p36_p7 = scmp.eq.s32.totalorder %s33_s17, 0 }
   0xd   : > { %p495_p8 = por %p52_p5, %p51_p3  ;;  %p83_p10 = scmp.eq.s32.totalorder %s248_s13, 1 }
   0xe   : > { %p499_p9 = por %p77_p6, %p45_p1  ;;  %p272_p13 = scmp.lt.s32.totalorder %s434_s11, 2 }
   0xf   : > { %s504_s20 = scalar_select %p36_p7, %s422_s8, %s38_s15  }
  0x10   : > { %s625_s19 = scalar_select %p499_p9, 1, 0 }
  0x11   : > { %p506_p11 = por %p83_p10, %p51_p3  ;;  %s103_s22 = sand.u32 1, %s422_s8  }
  0x12   : > { %s251_s23 = sshll.u32 %s103_s22, 3  ;;  %s252_s24 = sshll.u32 %s430_s10, 7 }
  0x13   : > { %s626_s21 = scalar_select %p506_p11, 1, 0 }
  0x14   : > { %s517_s27 = scalar_lea.hbm %s620_s0, %s252_s24  ;;  %s107_s28 = scalar_lea.vmem [#allocation2], %s251_s23 }
  0x15   : > { %s115_s29 = sshll.u32 %s107_s28, 4  ;;  %p523_p0 = pnand %p272_p13, %p489_p4  ;;  %s519_s29 = int_to_ptr.vmem [resolvable:$true] %s115_s29 }
  0x16   : > { %s104_s2 = scalar_lea.sflag [#allocation3], %s103_s22  ;;  %s322_s3 = scalar_lea.hbm %s517_s27, 128 }
  0x17   : > { %p323_p3 = scmp.ne.s32.totalorder %s517_s27, %s322_s3  ;;  %p324_p5 = pneg %p523_p0 }
  0x18   : > { %s327_s12 = scalar_lea.hbm %s620_s0, 256  ;;  %p328_p4 = scmp.lt.u32.totalorder %s517_s27, %s620_s0 }
  0x19   : > { %p325_p6 = pnand %p324_p5, %p323_p3  ;;  %p329_p10 = scmp.lt.u32.totalorder %s327_s12, %s322_s3 }
  0x1a   : > { %p331_p12 = scmp.lt.u32.totalorder %s322_s3, %s517_s27 }
  0x1b   : > { %p326_p7 = pneg %p325_p6  ;;  %p330_p13 = por %p329_p10, %p328_p4 }
  0x1d   : > { %p332_p1 = por %p331_p12, %p330_p13 }
  0x1f   : > { %p333_p2 = pnand %p332_p1, %p326_p7 }
  0x21   : > { %336 = shalt.err (!%p333_p2)
}
  0x22   : > { %s337_s16 = scalar_lea.vmem %s519_s29, 128  ;;  %s436_s17 = smov [#allocation2]  }
  0x23   : > { %p338_p3 = scmp.ne.s32.totalorder %s519_s29, %s337_s16  ;;  %s342_s22 = sshll.u32 %s436_s17, 4  ;;  %s343_s22 = int_to_ptr.vmem [resolvable:$false] %s342_s22 }
  0x24   : > { %s344_s23 = scalar_lea.vmem %s343_s22, 256  ;;  %p345_p9 = scmp.lt.s32.totalorder %s519_s29, %s343_s22 }
  0x25   : > { %p340_p6 = pnand %p338_p3, %p324_p5  ;;  %p346_p4 = scmp.lt.s32.totalorder %s344_s23, %s337_s16 }
  0x27   : > { %p341_p11 = pneg %p340_p6  ;;  %p347_p10 = por %p346_p4, %p345_p9 }
  0x29   : > { %p348_p12 = pnand %p347_p10, %p341_p11 }
  0x2b   : > { %351 = shalt.err (!%p348_p12)
}
  0x2c   : > { %267 = dma.hbm_to_vmem [thread:$0]  (!%p523_p0), %s517_s27, 128, %s519_s29, %s104_s2  }
  0x2d   : > { %p628_p1 = scmp.lt.s32.totalorder %s434_s11, 3  ;;  %p629_p2 = scmp.ge.s32.totalorder %s434_s11, 1 }
  0x2f   : > { %p121_p5 = pnand %p629_p2, %p628_p1 }
  0x30   : > { %s559_s24 = sand.u32 (!%p121_p5), 1, %s418_s7  }
  0x31   : > { %124 = sbr.rel (%p121_p5) target bundleno = 83 (0x53), region = 24  ;;  %s254_s25 = sshll.u32 (!%p121_p5), %s559_s24, 3 }
  0x32   : > { %s127_s26 = scalar_lea.sflag (!%p121_p5), [#allocation3], %s559_s24  ;;  %s130_s28 = scalar_lea.vmem (!%p121_p5), [#allocation2], %s254_s25 }
  0x38   : > { %405 = dma.done.wait (%p495_p8), %s127_s26, 128  }
  0x39   : > { %407 = vsyncadd (%p495_p8), %s127_s26, 4294967168  ;;  %s148_s27 = scalar_lea.vmem [#allocation5], %s254_s25  ;;  %s257_s30 = sshll.u32 %s426_s9, 7  ;;  %vm150_vm0 = vcmask 261120   ;;  %v149_v0 = vld [vmem:[%s130_s28] sm:$0xff] }
  0x3a   : > { %s167_s29 = sshll.u32 %s148_s27, 4  ;;  %s573_s4 = scalar_lea.hbm %s621_s1, %s257_s30  ;;  %151 = vst.msk [vmem:[%s148_s27] sm:$0xff] %vm150_vm0, %v149_v0  ;;  %s568_s29 = int_to_ptr.vmem [resolvable:$true] %s167_s29 }
  0x3b   : > { %s153_s18 = scalar_lea.sflag [#allocation4], %s559_s24  ;;  %s352_s5 = scalar_lea.vmem %s568_s29, 128 }
  0x3c   : > { %p353_p8 = scmp.ne.s32.totalorder %s568_s29, %s352_s5  ;;  %p630_p9 = scmp.ne.s32.totalorder %s625_s19, 0 }
  0x3d   : > { %s437_s9 = smov [#allocation5]  }
  0x3e   : > { %p354_p11 = pnand %p353_p8, %p630_p9  ;;  %s356_s12 = sshll.u32 %s437_s9, 4  ;;  %s357_s12 = int_to_ptr.vmem [resolvable:$false] %s356_s12 }
  0x3f   : > { %s358_s13 = scalar_lea.vmem %s357_s12, 256  ;;  %p359_p7 = scmp.lt.s32.totalorder %s568_s29, %s357_s12 }
  0x40   : > { %p355_p0 = pneg %p354_p11  ;;  %p360_p13 = scmp.lt.s32.totalorder %s358_s13, %s352_s5 }
  0x42   : > { %p361_p3 = por %p360_p13, %p359_p7 }
  0x44   : > { %p362_p6 = pnand %p361_p3, %p355_p0 }
  0x46   : > { %365 = shalt.err (!%p362_p6)
}
  0x47   : > { %s366_s15 = scalar_lea.hbm %s573_s4, 128  ;;  %s370_s22 = scalar_lea.hbm %s621_s1, 256 }
  0x48   : > { %p367_p4 = scmp.ne.s32.totalorder %s573_s4, %s366_s15  ;;  %p371_p1 = scmp.lt.u32.totalorder %s573_s4, %s621_s1 }
  0x49   : > { %p372_p2 = scmp.lt.u32.totalorder %s370_s22, %s366_s15  ;;  %p374_p8 = scmp.lt.u32.totalorder %s366_s15, %s573_s4 }
  0x4a   : > { %p368_p10 = pnand %p367_p4, %p630_p9 }
  0x4b   : > { %p373_p5 = por %p372_p2, %p371_p1 }
  0x4c   : > { %p369_p12 = pneg %p368_p10 }
  0x4d   : > { %p375_p11 = por %p374_p8, %p373_p5 }
  0x4f   : > { %p376_p0 = pnand %p375_p11, %p369_p12 }
  0x51   : > { %379 = shalt.err (!%p376_p0)
}
  0x52   : > { %262 = dma.vmem_to_hbm [thread:$0]  (%p630_p9), %s568_s29, 128, %s573_s4, %s153_s18  }
  0x53 PF: > { %s179_s25 = sand.u32 1, %s414_s6   ;;  %p631_p7 = scmp.ne.s32.totalorder %s626_s21, 0 }
  0x54   : > { %p632_p13 = scmp.ge.s32.totalorder %s434_s11, 2  ;;  %s180_s26 = scalar_lea.sflag [#allocation4], %s179_s25 }
  0x56   : > { %p269_p3 = pnand %p632_p13, %p631_p7 }
  0x58   : > { %409 = dma.done.wait (!%p269_p3), %s180_s26, 128  }
  0x59   : > { %411 = vsyncadd (!%p269_p3), %s180_s26, 4294967168  ;;  %s17_s11 = sadd.s32 1, %s434_s11   ;;  %s633_s6 = smov %s418_s7 }
  0x5a   : > { %p14_p6 = scmp.ge.s32.totalorder %s17_s11, 4   ;;  %s634_s7 = smov %s422_s8 }
  0x5b   : > { %s635_s8 = smov %s504_s20  ;;  %s636_s9 = smov %s430_s10 }
  0x5c   : > { %s637_s10 = smov %s639_s14  ;;  %16 = sbr.rel (!%p14_p6) target bundleno = 6 (0x6), region = 69 }
  0x63   :  { %185 = vsyncpa [#allocation3], 1 }
  0x64   :  { %187 = vsyncpa [#allocation3 + $0x1], 1 }
  0x65   :  { %188 = vsyncpa [#allocation4], 1 }
  0x66   :  { %190 = vsyncpa [#allocation4 + $0x1], 1 }

</bundles_post_ra>
